<compile_context>
chip_gen: v5e
topology: v5e:2x2
jax: 0.10.0
libtpu: 0.0.40
codegen_flags: <defaults>
</compile_context>

<pallas_src>
import functools

import jax
import jax.numpy as jnp
from jax.experimental import pallas as pl
from jax.experimental.pallas import tpu as pltpu


def _round_up(a, b):
    return (a + b - 1) // b * b


# -----------------------------------------------------------------------------
# Pallas kernel: one batch tile of the whole D2RL (num_layers=4) MLP.
# -----------------------------------------------------------------------------
def d2rl_kernel(
    x_ref,        # [TILE_B, num_inputs]
    w_in_ref,     # [num_inputs, 4H]  columns = [W1 | Wx2 | Wx3 | Wx4]
    b_in_ref,     # [1, 4H]           columns = [b1 | b2  | b3  | b4 ]
    w_hid_ref,    # [3, H, H]         stacked W2h, W3h, W4h (multiply h)
    wo_ref,       # [H, out_dim]
    bo_ref,       # [1, out_dim]
    o_ref,        # [TILE_B, out_dim]
):
    H = w_hid_ref.shape[1]
    x = x_ref[...]

    # One fused matmul: layer-1 pre-activation + all three skip terms + biases.
    xp = (
        jnp.dot(x, w_in_ref[...], preferred_element_type=jnp.float32)
        + b_in_ref[...]
    )

    # x1 = relu(l1_1(xu))
    h = jnp.maximum(xp[:, 0:H], 0.0)
    # x1 = relu(l1_2(cat([x1, xu])))  ==  relu(h @ W2h + x @ Wx2 + b2)
    h = jnp.maximum(
        jnp.dot(h, w_hid_ref[0], preferred_element_type=jnp.float32)
        + xp[:, H:2 * H],
        0.0,
    )
    # x1 = relu(l1_3(cat([x1, xu])))
    h = jnp.maximum(
        jnp.dot(h, w_hid_ref[1], preferred_element_type=jnp.float32)
        + xp[:, 2 * H:3 * H],
        0.0,
    )
    # x1 = relu(l1_4(cat([x1, xu])))   (num_layers == 4 -> no trailing cat)
    h = jnp.maximum(
        jnp.dot(h, w_hid_ref[2], preferred_element_type=jnp.float32)
        + xp[:, 3 * H:4 * H],
        0.0,
    )

    # out1 (un-padded out_dim columns: only real bytes go back to HBM)
    o_ref[...] = (
        jnp.dot(h, wo_ref[...], preferred_element_type=jnp.float32) + bo_ref[...]
    ).astype(o_ref.dtype)


# -----------------------------------------------------------------------------
# Parameter init (matches PyTorch weights_init_: xavier_uniform, zero bias).
# PyTorch weight is [out, in]; we build directly in [in, out] (xavier limit is
# symmetric in fan_in/fan_out).
# -----------------------------------------------------------------------------
def xavier_uniform(key, fan_in, fan_out, dtype=jnp.float32):
    limit = jnp.sqrt(6.0 / (fan_in + fan_out))
    return jax.random.uniform(
        key, (fan_in, fan_out), dtype=dtype, minval=-limit, maxval=limit
    )


def init_d2rl_params(key, num_inputs, hidden_dim, output_dim):
    in_dim = num_inputs + hidden_dim
    keys = jax.random.split(key, 5)
    return {
        "w1": xavier_uniform(keys[0], num_inputs, hidden_dim),
        "b1": jnp.zeros((1, hidden_dim), jnp.float32),
        "w2": xavier_uniform(keys[1], in_dim, hidden_dim),
        "b2": jnp.zeros((1, hidden_dim), jnp.float32),
        "w3": xavier_uniform(keys[2], in_dim, hidden_dim),
        "b3": jnp.zeros((1, hidden_dim), jnp.float32),
        "w4": xavier_uniform(keys[3], in_dim, hidden_dim),
        "b4": jnp.zeros((1, hidden_dim), jnp.float32),
        "wo": xavier_uniform(keys[4], hidden_dim, output_dim),
        "bo": jnp.zeros((1, output_dim), jnp.float32),
    }


# -----------------------------------------------------------------------------
# One-time weight prep (OUTSIDE the jitted forward):
#   * split each concat-layer weight into its hidden ([:H]) and input ([H:])
#     part (cat order is [h, x]),
#   * fuse w1 + the three input parts into one [num_inputs, 4H] slab and
#     fuse all four hidden biases into one [1, 4H] slab,
#   * stack the three hidden parts into a [3, H, H] slab.
# -----------------------------------------------------------------------------
def prepare_params(params, hidden_dim):
    H = hidden_dim
    out_dim = int(params["wo"].shape[1])

    w_in = jnp.concatenate(
        [params["w1"], params["w2"][H:], params["w3"][H:], params["w4"][H:]],
        axis=1,
    )  # [num_inputs, 4H]
    b_in = jnp.concatenate(
        [params["b1"], params["b2"], params["b3"], params["b4"]], axis=1
    )  # [1, 4H]
    w_hid = jnp.stack(
        [params["w2"][:H], params["w3"][:H], params["w4"][:H]], axis=0
    )  # [3, H, H]

    prepped = {
        "w_in": w_in,
        "b_in": b_in,
        "w_hid": w_hid,
        "wo": params["wo"],
        "bo": params["bo"],
    }
    # Materialize contiguous slabs once so the kernel DMAs rectangular blocks.
    prepped = jax.tree_util.tree_map(jnp.asarray, prepped)
    return prepped, out_dim


# -----------------------------------------------------------------------------
# Forward: grid over batch, weights VMEM-resident, un-padded output columns.
# -----------------------------------------------------------------------------
@functools.partial(jax.jit, static_argnames=("out_dim", "tile_b"))
def d2rl_forward(x, prepped, *, out_dim, tile_b=None):
    B, num_inputs = x.shape
    H = prepped["w_hid"].shape[1]

    # Batch tile: derive from the number of tiles so padding never balloons
    # (e.g. B=513 -> 1 tile of 520, not 2x512).  2048 rows/tile amortizes the
    # ~0.35 us/step pipeline overhead to noise and stays tiny in VMEM on every
    # generation (v7x 32 MiB scoped default included).
    MAX_TILE = 2048
    if tile_b is None:
        n_tiles_target = -(-B // MAX_TILE)
        tile_b = _round_up(-(-B // n_tiles_target), 8)
    tile_b = max(8, _round_up(int(tile_b), 8))
    b_pad = _round_up(B, tile_b)
    if b_pad != B:
        x = jnp.pad(x, ((0, b_pad - B), (0, 0)))
    n_tiles = b_pad // tile_b

    def resident(arr):
        # Whole array as one block, same block every grid step -> loaded once.
        nd = arr.ndim
        return pl.BlockSpec(arr.shape, lambda *_: (0,) * nd)

    flops = 2 * b_pad * (
        num_inputs * 4 * H        # fused x @ [W1|Wx2|Wx3|Wx4]
        + 3 * H * H               # h @ W_h for l1_2..l1_4
        + H * out_dim             # out1
    )
    bytes_accessed = 4 * (
        b_pad * num_inputs
        + sum(int(v.size) for v in jax.tree_util.tree_leaves(prepped))
        + b_pad * out_dim
    )

    out = pl.pallas_call(
        d2rl_kernel,
        out_shape=jax.ShapeDtypeStruct((b_pad, out_dim), jnp.float32),
        grid=(n_tiles,),
        in_specs=[
            pl.BlockSpec((tile_b, num_inputs), lambda i: (i, 0)),
            resident(prepped["w_in"]),
            resident(prepped["b_in"]),
            resident(prepped["w_hid"]),
            resident(prepped["wo"]),
            resident(prepped["bo"]),
        ],
        out_specs=pl.BlockSpec((tile_b, out_dim), lambda i: (i, 0)),
        compiler_params=pltpu.CompilerParams(
            dimension_semantics=("parallel",),  # shard batch tiles across TCs (v7x)
        ),
        cost_estimate=pl.CostEstimate(
            flops=flops, transcendentals=0, bytes_accessed=bytes_accessed
        ),
    )(
        x,
        prepped["w_in"],
        prepped["b_in"],
        prepped["w_hid"],
        prepped["wo"],
        prepped["bo"],
    )
    # Strip batch padding only (output columns are already exactly out_dim).
    return out[:B]


# -----------------------------------------------------------------------------
# Pure-JAX reference (mirrors the PyTorch forward with num_layers=4).
# -----------------------------------------------------------------------------
def d2rl_reference(x, params):
    xu = x
    h = jax.nn.relu(xu @ params["w1"] + params["b1"])
    h = jnp.concatenate([h, xu], axis=1)
    h = jax.nn.relu(h @ params["w2"] + params["b2"])
    h = jnp.concatenate([h, xu], axis=1)
    h = jax.nn.relu(h @ params["w3"] + params["b3"])
    h = jnp.concatenate([h, xu], axis=1)
    h = jax.nn.relu(h @ params["w4"] + params["b4"])
    return h @ params["wo"] + params["bo"]


if __name__ == "__main__":
    NUM_INPUTS, HIDDEN, OUT = 16, 32, 8

    key = jax.random.PRNGKey(0)
    kx, kp, kx2, kx3 = jax.random.split(key, 4)
    params = init_d2rl_params(kp, NUM_INPUTS, HIDDEN, OUT)
    prepped, out_dim = prepare_params(params, HIDDEN)

    # Small batch: single grid step.
    x = jax.random.normal(kx, (8, NUM_INPUTS), jnp.float32)
    out = jax.block_until_ready(d2rl_forward(x, prepped, out_dim=out_dim))
    ref = d2rl_reference(x, params)
    assert out.shape == (8, OUT)
    assert jnp.allclose(out, ref, atol=1e-4, rtol=1e-4), "mismatch vs reference (B=8)"

    # Multi-step grid over the batch (3 tiles of 16 rows) exercises the
    # pipelining + resident-weight path.
    x2 = jax.random.normal(kx2, (48, NUM_INPUTS), jnp.float32)
    out2 = jax.block_until_ready(
        d2rl_forward(x2, prepped, out_dim=out_dim, tile_b=16)
    )
    ref2 = d2rl_reference(x2, params)
    assert out2.shape == (48, OUT)
    assert jnp.allclose(out2, ref2, atol=1e-4, rtol=1e-4), "mismatch vs reference (B=48)"

    # Non-multiple-of-8 batch with the default tile heuristic (pads to 56).
    x3 = jax.random.normal(kx3, (50, NUM_INPUTS), jnp.float32)
    out3 = jax.block_until_ready(d2rl_forward(x3, prepped, out_dim=out_dim))
    ref3 = d2rl_reference(x3, params)
    assert out3.shape == (50, OUT)
    assert jnp.allclose(out3, ref3, atol=1e-4, rtol=1e-4), "mismatch vs reference (B=50)"

    print("KERNEL_OK")
</pallas_src>

<mosaic_0001>
module attributes {stable_mosaic.version = 11 : i64} {
  func.func @d2rl_kernel(%arg0: i32, %arg1: memref<8x16xf32, #tpu.memory_space<vmem>>, %arg2: memref<16x128xf32, #tpu.memory_space<vmem>>, %arg3: memref<1x128xf32, #tpu.memory_space<vmem>>, %arg4: memref<3x32x32xf32, #tpu.memory_space<vmem>>, %arg5: memref<32x8xf32, #tpu.memory_space<vmem>>, %arg6: memref<1x8xf32, #tpu.memory_space<vmem>>, %arg7: memref<8x8xf32, #tpu.memory_space<vmem>>) attributes {dimension_semantics = [#tpu.dimension_semantics<parallel>], iteration_bounds = array<i64: 1>, scalar_prefetch = 0 : i64, scratch_operands = 0 : i64, tpu.core_type = #tpu.core_type<tc>, window_params = [{transform_indices = @transform_0, window_bounds = array<i64: 8, 16>}, {pipeline_mode = #tpu.pipeline_mode<synchronous>, transform_indices = @transform_1, window_bounds = array<i64: 16, 128>}, {pipeline_mode = #tpu.pipeline_mode<synchronous>, transform_indices = @transform_2, window_bounds = array<i64: 1, 128>}, {pipeline_mode = #tpu.pipeline_mode<synchronous>, transform_indices = @transform_3, window_bounds = array<i64: 3, 32, 32>}, {pipeline_mode = #tpu.pipeline_mode<synchronous>, transform_indices = @transform_4, window_bounds = array<i64: 32, 8>}, {pipeline_mode = #tpu.pipeline_mode<synchronous>, transform_indices = @transform_5, window_bounds = array<i64: 1, 8>}, {transform_indices = @transform_6, window_bounds = array<i64: 8, 8>}]} {
    %c0 = arith.constant 0 : index
    %c0_0 = arith.constant 0 : index
    %0 = vector.load %arg1[%c0, %c0_0] : memref<8x16xf32, #tpu.memory_space<vmem>>, vector<8x16xf32>
    %c0_1 = arith.constant 0 : index
    %c0_2 = arith.constant 0 : index
    %1 = vector.load %arg2[%c0_1, %c0_2] : memref<16x128xf32, #tpu.memory_space<vmem>>, vector<16x128xf32>
    %cst = arith.constant dense<0.000000e+00> : vector<8x128xf32>
    %2 = tpu.matmul %0, %1, %cst {dimension_numbers = #tpu.dot_dimension_numbers<[1], [0], [0], [1], [0, 0, 1, 1], [], []>} : vector<8x16xf32>, vector<16x128xf32>, vector<8x128xf32> -> vector<8x128xf32>
    %c0_3 = arith.constant 0 : index
    %c0_4 = arith.constant 0 : index
    %3 = vector.load %arg3[%c0_3, %c0_4] : memref<1x128xf32, #tpu.memory_space<vmem>>, vector<1x128xf32>
    %4 = vector.broadcast %3 : vector<1x128xf32> to vector<8x128xf32>
    %5 = arith.addf %2, %4 : vector<8x128xf32>
    %6 = vector.extract_strided_slice %5 {offsets = [0, 0], sizes = [8, 32], strides = [1, 1]} : vector<8x128xf32> to vector<8x32xf32>
    %cst_5 = arith.constant 0.000000e+00 : f32
    %7 = vector.broadcast %cst_5 : f32 to vector<8x32xf32>
    %8 = arith.maximumf %6, %7 : vector<8x32xf32>
    %c0_6 = arith.constant 0 : index
    %c0_7 = arith.constant 0 : index
    %c0_8 = arith.constant 0 : index
    %9 = vector.load %arg4[%c0_6, %c0_7, %c0_8] : memref<3x32x32xf32, #tpu.memory_space<vmem>>, vector<1x32x32xf32>
    %10 = vector.shape_cast %9 : vector<1x32x32xf32> to vector<32x32xf32>
    %cst_9 = arith.constant dense<0.000000e+00> : vector<8x32xf32>
    %11 = tpu.matmul %8, %10, %cst_9 {dimension_numbers = #tpu.dot_dimension_numbers<[1], [0], [0], [1], [0, 0, 1, 1], [], []>} : vector<8x32xf32>, vector<32x32xf32>, vector<8x32xf32> -> vector<8x32xf32>
    %12 = vector.extract_strided_slice %5 {offsets = [0, 32], sizes = [8, 32], strides = [1, 1]} : vector<8x128xf32> to vector<8x32xf32>
    %13 = arith.addf %11, %12 : vector<8x32xf32>
    %cst_10 = arith.constant 0.000000e+00 : f32
    %14 = vector.broadcast %cst_10 : f32 to vector<8x32xf32>
    %15 = arith.maximumf %13, %14 : vector<8x32xf32>
    %c1 = arith.constant 1 : index
    %c0_11 = arith.constant 0 : index
    %c0_12 = arith.constant 0 : index
    %16 = vector.load %arg4[%c1, %c0_11, %c0_12] : memref<3x32x32xf32, #tpu.memory_space<vmem>>, vector<1x32x32xf32>
    %17 = vector.shape_cast %16 : vector<1x32x32xf32> to vector<32x32xf32>
    %cst_13 = arith.constant dense<0.000000e+00> : vector<8x32xf32>
    %18 = tpu.matmul %15, %17, %cst_13 {dimension_numbers = #tpu.dot_dimension_numbers<[1], [0], [0], [1], [0, 0, 1, 1], [], []>} : vector<8x32xf32>, vector<32x32xf32>, vector<8x32xf32> -> vector<8x32xf32>
    %19 = vector.extract_strided_slice %5 {offsets = [0, 64], sizes = [8, 32], strides = [1, 1]} : vector<8x128xf32> to vector<8x32xf32>
    %20 = arith.addf %18, %19 : vector<8x32xf32>
    %cst_14 = arith.constant 0.000000e+00 : f32
    %21 = vector.broadcast %cst_14 : f32 to vector<8x32xf32>
    %22 = arith.maximumf %20, %21 : vector<8x32xf32>
    %c2 = arith.constant 2 : index
    %c0_15 = arith.constant 0 : index
    %c0_16 = arith.constant 0 : index
    %23 = vector.load %arg4[%c2, %c0_15, %c0_16] : memref<3x32x32xf32, #tpu.memory_space<vmem>>, vector<1x32x32xf32>
    %24 = vector.shape_cast %23 : vector<1x32x32xf32> to vector<32x32xf32>
    %cst_17 = arith.constant dense<0.000000e+00> : vector<8x32xf32>
    %25 = tpu.matmul %22, %24, %cst_17 {dimension_numbers = #tpu.dot_dimension_numbers<[1], [0], [0], [1], [0, 0, 1, 1], [], []>} : vector<8x32xf32>, vector<32x32xf32>, vector<8x32xf32> -> vector<8x32xf32>
    %26 = vector.extract_strided_slice %5 {offsets = [0, 96], sizes = [8, 32], strides = [1, 1]} : vector<8x128xf32> to vector<8x32xf32>
    %27 = arith.addf %25, %26 : vector<8x32xf32>
    %cst_18 = arith.constant 0.000000e+00 : f32
    %28 = vector.broadcast %cst_18 : f32 to vector<8x32xf32>
    %29 = arith.maximumf %27, %28 : vector<8x32xf32>
    %c0_19 = arith.constant 0 : index
    %c0_20 = arith.constant 0 : index
    %30 = vector.load %arg5[%c0_19, %c0_20] : memref<32x8xf32, #tpu.memory_space<vmem>>, vector<32x8xf32>
    %cst_21 = arith.constant dense<0.000000e+00> : vector<8x8xf32>
    %31 = tpu.matmul %29, %30, %cst_21 {dimension_numbers = #tpu.dot_dimension_numbers<[1], [0], [0], [1], [0, 0, 1, 1], [], []>} : vector<8x32xf32>, vector<32x8xf32>, vector<8x8xf32> -> vector<8x8xf32>
    %c0_22 = arith.constant 0 : index
    %c0_23 = arith.constant 0 : index
    %32 = vector.load %arg6[%c0_22, %c0_23] : memref<1x8xf32, #tpu.memory_space<vmem>>, vector<1x8xf32>
    %33 = vector.broadcast %32 : vector<1x8xf32> to vector<8x8xf32>
    %34 = arith.addf %31, %33 : vector<8x8xf32>
    %c0_24 = arith.constant 0 : index
    %c0_25 = arith.constant 0 : index
    %35 = vector.load %arg7[%c0_24, %c0_25] : memref<8x8xf32, #tpu.memory_space<vmem>>, vector<8x8xf32>
    tpu.vector_store %arg7[%c0_24, %c0_25], %34 {strides = array<i32>} : memref<8x8xf32, #tpu.memory_space<vmem>>, vector<8x8xf32>,
    return
  }
  func.func @transform_0(%arg0: i32) -> (i32, i32) {
    %c0_i32 = arith.constant 0 : i32
    %c0_i32_0 = arith.constant 0 : i32
    return %arg0, %c0_i32 : i32, i32
  }
  func.func @transform_1(%arg0: i32) -> (i32, i32) {
    %c0_i32 = arith.constant 0 : i32
    %c0_i32_0 = arith.constant 0 : i32
    %c0_i32_1 = arith.constant 0 : i32
    return %c0_i32, %c0_i32_0 : i32, i32
  }
  func.func @transform_2(%arg0: i32) -> (i32, i32) {
    %c0_i32 = arith.constant 0 : i32
    %c0_i32_0 = arith.constant 0 : i32
    %c0_i32_1 = arith.constant 0 : i32
    return %c0_i32, %c0_i32_0 : i32, i32
  }
  func.func @transform_3(%arg0: i32) -> (i32, i32, i32) {
    %c0_i32 = arith.constant 0 : i32
    %c0_i32_0 = arith.constant 0 : i32
    %c0_i32_1 = arith.constant 0 : i32
    %c0_i32_2 = arith.constant 0 : i32
    return %c0_i32, %c0_i32_0, %c0_i32_1 : i32, i32, i32
  }
  func.func @transform_4(%arg0: i32) -> (i32, i32) {
    %c0_i32 = arith.constant 0 : i32
    %c0_i32_0 = arith.constant 0 : i32
    %c0_i32_1 = arith.constant 0 : i32
    return %c0_i32, %c0_i32_0 : i32, i32
  }
  func.func @transform_5(%arg0: i32) -> (i32, i32) {
    %c0_i32 = arith.constant 0 : i32
    %c0_i32_0 = arith.constant 0 : i32
    %c0_i32_1 = arith.constant 0 : i32
    return %c0_i32, %c0_i32_0 : i32, i32
  }
  func.func @transform_6(%arg0: i32) -> (i32, i32) {
    %c0_i32 = arith.constant 0 : i32
    %c0_i32_0 = arith.constant 0 : i32
    return %arg0, %c0_i32 : i32, i32
  }
}

</mosaic_0001>

<bundles_post_ra>
// kernel: d2rl_forward.1
= control target key start
LH: loop header
LB: loop body
LE: loop exit
PB: predicated region body
PF: predicated region fallthrough
CT: control target
= control target key end

     0   :  { %11 = vsyncpa [#allocation3], 0  ;;  %s364_s0 = inlined_call_operand.vmem [shape: f32[8,16], index: 0, kind: input, shape index: {}]   ;;  %s365_s1 = inlined_call_operand.vmem [shape: f32[16,128], index: 1, kind: input, shape index: {}]   ;;  %s366_s2 = inlined_call_operand.vmem [shape: f32[1,128], index: 2, kind: input, shape index: {}]   ;;  %s367_s3 = inlined_call_operand.hbm [shape: f32[3,32,32], index: 3, kind: input, shape index: {}]   ;;  %s368_s4 = inlined_call_operand.vmem [shape: f32[32,8], index: 4, kind: input, shape index: {}]   ;;  %s369_s5 = inlined_call_operand.vmem [shape: f32[1,8], index: 5, kind: input, shape index: {}]   ;;  %s370_s6 = inlined_call_operand.hbm [shape: f32[8,8], index: 6, kind: output, shape index: {}]  }
   0x1   :  { %12 = vsyncpa [#allocation4], 0  ;;  %s23_s23 = sshll.u32 %s367_s3, 4  ;;  %s285_s24 = smov [#allocation2]   ;;  %s24_s23 = int_to_ptr.hbm [resolvable:$true] %s23_s23 }
   0x2   :  { %s25_s25 = sshll.u32 %s285_s24, 4  ;;  %s286_s26 = smov 128   ;;  %s26_s25 = int_to_ptr.vmem [resolvable:$true] %s25_s25 }
   0x3   :  { %s287_s27 = smov 8  }
   0x4   :  { %31 = dma.hbm_to_vmem [thread:$0]  %s24_s23, 1536, %s26_s25, [#allocation3], %s286_s26, %s286_s26, %s287_s27  }
   0x5   :  { %281 = dma.done.wait [#allocation3], 1536  }
   0x6   :  { %282 = vsyncadd [#allocation3], 4294965760  ;;  %v42_v0 = vld [vmem:[%s365_s1 + $0x8] sm:$0xff]  ;;  %v41_v1 = vld [vmem:[%s365_s1] sm:$0xff]  ;;  %vm47_vm0 = vcmask 130048   ;;  %vm80_vm1 = vcmask 261120  }
   0x7   :  { %65 = vmatpush.msra.mxu0 %v42_v0  ;;  %v40_v2 = vld [vmem:[%s364_s0] sm:$0xff]  ;;  %v75_v3 = vld [vmem:[#allocation2 + $0x18] sm:$0xff]  ;;  %v74_v4 = vld [vmem:[#allocation2 + $0x10] sm:$0xff]  ;;  %s288_s1 = smov 32   ;;  %s289_s0 = smov 96   ;;  %vm200_vm2 = vcmask 64512  }
   0x8   :  { %96 = vmatpush.msra.mxu1 %v75_v3  ;;  %v73_v5 = vld [vmem:[#allocation2 + $0x8] sm:$0xff]  ;;  %v72_v6 = vld [vmem:[#allocation2] sm:$0xff]  ;;  %s290_s11 = smov 64   ;;  %v109_v11 = vld [vmem:[#allocation2 + $0x38] sm:$0xff]  ;;  %s291_s21 = smov [#allocation5]  }
   0x9   :  { %66 = vmatpush.msra.mxu0 %v41_v1  ;;  %v231_v7 = vld [vmem:[%s366_s2] ss:$0 sm:$0xff]  ;;  %128 = vmatpush.msra.mxu2 %v109_v11  ;;  %v108_v12 = vld [vmem:[#allocation2 + $0x30] sm:$0xff]  ;;  %v107_v13 = vld [vmem:[#allocation2 + $0x28] sm:$0xff]  ;;  %s207_s22 = sshll.u32 %s291_s21, 4  ;;  %s209_s25 = sshll.u32 %s370_s6, 4  ;;  %s208_s22 = int_to_ptr.vmem [resolvable:$true] %s207_s22  ;;  %s210_s25 = int_to_ptr.hbm [resolvable:$true] %s209_s25 }
   0xa   :  { %219 = vmatmul.msk.f32.vlgmr.msra.gmra.mxu0 %vm47_vm0, %v40_v2  ;;  %97 = vmatpush.msra.mxu1 %v74_v4  ;;  %v106_v14 = vld [vmem:[#allocation2 + $0x20] sm:$0xff]  ;;  %v141_v15 = vld [vmem:[#allocation2 + $0x58] sm:$0xff]  ;;  %v140_v20 = vld [vmem:[#allocation2 + $0x50] sm:$0xff] }
   0xb   :  { %129 = vmatpush.msra.mxu2 %v108_v12  ;;  %160 = vmatpush.msra.mxu3 %v141_v15  ;;  %v139_v21 = vld [vmem:[#allocation2 + $0x48] sm:$0xff]  ;;  %v138_v22 = vld [vmem:[#allocation2 + $0x40] sm:$0xff]  ;;  %v172_v23 = vld [vmem:[%s368_s4 + $0x18] sm:$0xff] }
   0xc   :  { %98 = vmatpush.msra.mxu1 %v73_v5  ;;  %v171_v24 = vld [vmem:[%s368_s4 + $0x10] sm:$0xff]  ;;  %192 = vmatpush.msrb.mxu0 %v172_v23  ;;  %v170_v29 = vld [vmem:[%s368_s4 + $0x8] sm:$0xff]  ;;  %v169_v30 = vld [vmem:[%s368_s4] sm:$0xff] }
   0xd   :  { %130 = vmatpush.msra.mxu2 %v107_v13  ;;  %161 = vmatpush.msra.mxu3 %v140_v20  ;;  %v232_v35 = vld [vmem:[%s369_s5] ss:$0 sm:$0xff] }
   0xe   :  { %99 = vmatpush.msra.mxu1 %v72_v6  ;;  %193 = vmatpush.msrb.mxu0 %v171_v24 }
   0xf   :  { %131 = vmatpush.msra.mxu2 %v106_v14  ;;  %162 = vmatpush.msra.mxu3 %v139_v21 }
  0x10   :  { %194 = vmatpush.msrb.mxu0 %v170_v29 }
  0x11   :  { %163 = vmatpush.msra.mxu3 %v138_v22 }
  0x12   :  { %195 = vmatpush.msrb.mxu0 %v169_v30 }
  0x87   :  { %v68_v8 = vpop.f32.mrf.mxu0 }
  0x88   :  { %v69_v9 = vadd.f32 %v231_v7, %v68_v8 }
  0x8a   :  { %142 = vrot.lane.b32.xlu1 %v69_v9, %s288_s1  ;;  %77 = vrot.lane.b32.xlu0 %v69_v9, %s289_s0  ;;  %v71_v10 = vmax.f32 %v69_v9, 0.0 }
  0x8c   :  { %220 = vmatmul.msk.f32.vlgmr.msra.gmra.mxu1 %vm80_vm1, %v71_v10 }
  0x92   :  { %110 = vrot.lane.b32.xlu0 %v69_v9, %s290_s11 }
  0xfc   :  { %v78_v16 = vpop.permute.xlu0 %77  ;;  %v143_v31 = vpop.permute.xlu1 %142 }
 0x104   :  { %v111_v25 = vpop.permute.xlu0 %110 }
 0x109   :  { %v101_v17 = vpop.f32.mrf.mxu1 }
 0x10a   :  { %v102_v18 = vadd.f32 %v101_v17, %v78_v16 }
 0x10c   :  { %v104_v19 = vmax.f32 %v102_v18, 0.0 }
 0x10e   :  { %221 = vmatmul.msk.f32.vlgmr.msra.gmra.mxu2 %vm80_vm1, %v104_v19 }
 0x191   :  { %v133_v26 = vpop.f32.mrf.mxu2 }
 0x192   :  { %v134_v27 = vadd.f32 %v133_v26, %v111_v25 }
 0x194   :  { %v136_v28 = vmax.f32 %v134_v27, 0.0 }
 0x196   :  { %222 = vmatmul.msk.f32.vlgmr.msra.gmra.mxu3 %vm80_vm1, %v136_v28 }
 0x219   :  { %v165_v32 = vpop.f32.mrf.mxu3 }
 0x21a   :  { %v166_v33 = vadd.f32 %v165_v32, %v143_v31 }
 0x21c   :  { %v168_v34 = vmax.f32 %v166_v33, 0.0 }
 0x21e   :  { %223 = vmatmul.msk.f32.vlgmr.msrb.gmra.mxu0 %vm80_vm1, %v168_v34 }
 0x29b   :  { %v197_v36 = vpop.f32.mrf.mxu0 }
 0x29c   :  { %v198_v37 = vadd.f32 %v232_v35, %v197_v36 }
 0x29e   :  { %201 = vst.msk [vmem:[#allocation5] sm:$0xff] %vm200_vm2, %v198_v37 }
 0x29f   :  { %212 = dma.vmem_to_hbm [thread:$0]  %s208_s22, 128, %s210_s25, [#allocation4]  }
 0x2a0   :  { %283 = dma.done.wait [#allocation4], 128  }
 0x2a1   :  { %284 = vsyncadd [#allocation4], 4294967168 }
 0x2a2   :  { %217 = vsyncpa [#allocation3], 1 }
 0x2a3   :  { %218 = vsyncpa [#allocation4], 1 }

</bundles_post_ra>
